<compile_context>
chip_gen: v5e
topology: v5e:2x2
jax: 0.10.0
libtpu: 0.0.40
codegen_flags: <defaults>
</compile_context>

<pallas_src>
import functools
import math

import jax
import jax.numpy as jnp
from jax import lax
from jax.experimental import pallas as pl
from jax.experimental.pallas import tpu as pltpu


# ----------------------------- tile helpers ---------------------------------

def _tile_sublane(dim, target):
    """Tile for a second-to-last block dim: multiple of 8, dividing dim, else full."""
    t = min(target, dim)
    if dim % t == 0 and t % 8 == 0:
        return t
    return dim  # fall back to full extent (small / ragged shapes)


def _tile_lane(dim, target):
    """Tile for a last block dim: multiple of 128, dividing dim, else full."""
    t = min(target, dim)
    if dim % t == 0 and t % 128 == 0:
        return t
    return dim


# ----------------------------- Pallas kernels -------------------------------

def _linear_kernel(x_ref, w_ref, b_ref, o_ref, acc_ref):
    """One (p, i, j, k) tile of y = x @ W^T + b  (nn.Linear semantics).

    x_ref: [tm, tk]   w_ref: [tn, tk] (PyTorch [out, in] layout)
    b_ref: [1, tn]    o_ref: [tm, tn] acc_ref: [tm, tn] f32 scratch
    """
    k = pl.program_id(3)

    @pl.when(k == 0)
    def _():
        acc_ref[...] = jnp.zeros_like(acc_ref)

    # Contract the shared D_in axis directly (trans_b) -> no in-kernel transpose.
    acc_ref[...] += lax.dot_general(
        x_ref[...], w_ref[...],
        dimension_numbers=(((1,), (1,)), ((), ())),
        preferred_element_type=jnp.float32)

    @pl.when(k == pl.num_programs(3) - 1)
    def _():
        o_ref[...] = (acc_ref[...] + b_ref[...]).astype(o_ref.dtype)


def _linear_kernel_single_k(x_ref, w_ref, b_ref, o_ref):
    """Single k-tile specialization: no accumulator scratch / write-through."""
    o_ref[...] = (
        lax.dot_general(
            x_ref[...], w_ref[...],
            dimension_numbers=(((1,), (1,)), ((), ())),
            preferred_element_type=jnp.float32)
        + b_ref[...]).astype(o_ref.dtype)


def _attn_kernel(q_ref, k_ref, v_ref, o_ref, m_sc, l_sc, acc_sc, *,
                 num_heads, d_k, scale):
    """Flash-style attention for one (batch, q-tile, kv-tile) step.

    q_ref: [tq, D]  k_ref/v_ref: [tkv, D]  o_ref: [tq, D]   (D = H * d_k)
    m_sc/l_sc: [tq, H] f32 (heads on lane axis)   acc_sc: [tq, D] f32
    """
    kv_idx = pl.program_id(2)

    @pl.when(kv_idx == 0)
    def _():
        m_sc[...] = jnp.full_like(m_sc, -jnp.inf)
        l_sc[...] = jnp.zeros_like(l_sc)
        acc_sc[...] = jnp.zeros_like(acc_sc)

    q = q_ref[...].astype(jnp.float32) * scale          # scale once, not per head
    kk = k_ref[...].astype(jnp.float32)
    vv = v_ref[...].astype(jnp.float32)

    m_prev = m_sc[...]                                  # [tq, H] single load
    l_prev = l_sc[...]                                  # [tq, H] single load
    tq = q.shape[0]

    m_cols, l_cols, alpha_cols, pv_cols = [], [], [], []
    # Heads are static column slices of the lane-dense block (unrolled loop).
    for h in range(num_heads):
        lo, hi = h * d_k, (h + 1) * d_k
        q_h = q[:, lo:hi]                               # [tq, d_k]
        k_h = kk[:, lo:hi]                              # [tkv, d_k]
        v_h = vv[:, lo:hi]                              # [tkv, d_k]

        # Q K^T with both operands in natural layout (contract d_k of each).
        s = lax.dot_general(q_h, k_h,
                            dimension_numbers=(((1,), (1,)), ((), ())),
                            preferred_element_type=jnp.float32)   # [tq, tkv]
        # TODO(synk): optional attention `mask` of the PyTorch forward is not
        # plumbed through (mask=None path only).

        m_old = m_prev[:, h:h + 1]                      # [tq, 1]
        m_new = jnp.maximum(m_old, jnp.max(s, axis=-1, keepdims=True))
        alpha = jnp.exp(m_old - m_new)                  # [tq, 1]
        p = jnp.exp(s - m_new)                          # [tq, tkv]

        m_cols.append(m_new)
        l_cols.append(alpha * l_prev[:, h:h + 1]
                      + jnp.sum(p, axis=-1, keepdims=True))
        alpha_cols.append(jnp.broadcast_to(alpha, (tq, d_k)))
        pv_cols.append(jnp.dot(p, v_h, preferred_element_type=jnp.float32))

    # One lane-dense store per stat and ONE full-lane accumulator update per
    # kv step (instead of H partial-lane read-modify-writes).
    m_sc[...] = jnp.concatenate(m_cols, axis=-1)        # [tq, H]
    l_sc[...] = jnp.concatenate(l_cols, axis=-1)        # [tq, H]
    alpha_full = jnp.concatenate(alpha_cols, axis=-1)   # [tq, D]
    pv_full = jnp.concatenate(pv_cols, axis=-1)         # [tq, D]
    acc_sc[...] = alpha_full * acc_sc[...] + pv_full

    @pl.when(kv_idx == pl.num_programs(2) - 1)
    def _():
        # Normalize per head on the EUP, then one full-lane [tq, D] store.
        inv = pl.reciprocal(l_sc[...], approx=True)     # [tq, H]
        inv_full = jnp.concatenate(
            [jnp.broadcast_to(inv[:, h:h + 1], (tq, d_k))
             for h in range(num_heads)], axis=-1)       # [tq, D]
        o_ref[...] = (acc_sc[...] * inv_full).astype(o_ref.dtype)


# ------------------------------ Wrappers -------------------------------------

def pallas_linear_stacked(x, w, b, *, tm=256, tn=256, tk=256):
    """Batched nn.Linear: x [P, M, K], w [P, N, K] (PyTorch layout), b [P, 1, N].

    Returns [P, M, N]. P is a leading grid axis so several independent
    projections run in one pallas_call / one pipeline.
    """
    P, M, K = x.shape
    _, N, _ = w.shape
    tm = _tile_sublane(M, tm)
    tn = _tile_lane(N, tn)
    tk = _tile_lane(K, tk)
    kt = K // tk

    if kt == 1:
        # Whole contraction fits in one k-tile: scratch-free kernel.
        return pl.pallas_call(
            _linear_kernel_single_k,
            out_shape=jax.ShapeDtypeStruct((P, M, N), x.dtype),
            grid_spec=pltpu.PrefetchScalarGridSpec(
                num_scalar_prefetch=0,
                grid=(P, M // tm, N // tn),
                in_specs=[
                    pl.BlockSpec((None, tm, K), lambda p, i, j: (p, i, 0)),
                    pl.BlockSpec((None, tn, K), lambda p, i, j: (p, j, 0)),
                    pl.BlockSpec((None, 1, tn), lambda p, i, j: (p, 0, j)),
                ],
                out_specs=pl.BlockSpec((None, tm, tn), lambda p, i, j: (p, i, j)),
            ),
            compiler_params=pltpu.CompilerParams(
                dimension_semantics=("parallel", "parallel", "parallel")),
        )(x, w, b)

    return pl.pallas_call(
        _linear_kernel,
        out_shape=jax.ShapeDtypeStruct((P, M, N), x.dtype),
        grid_spec=pltpu.PrefetchScalarGridSpec(
            num_scalar_prefetch=0,
            grid=(P, M // tm, N // tn, kt),
            in_specs=[
                pl.BlockSpec((None, tm, tk), lambda p, i, j, k: (p, i, k)),
                pl.BlockSpec((None, tn, tk), lambda p, i, j, k: (p, j, k)),
                pl.BlockSpec((None, 1, tn), lambda p, i, j, k: (p, 0, j)),
            ],
            out_specs=pl.BlockSpec((None, tm, tn), lambda p, i, j, k: (p, i, j)),
            scratch_shapes=[pltpu.VMEM((tm, tn), jnp.float32)],
        ),
        compiler_params=pltpu.CompilerParams(
            dimension_semantics=("parallel", "parallel", "parallel", "arbitrary")),
    )(x, w, b)


def pallas_attention(q, k, v, *, num_heads, tq=256, tkv=256):
    """Scaled dot-product attention in lane-dense [B, S, D] layout.

    q/k/v: [B, S, D] with heads laid out contiguously along D (= H * d_k).
    Returns [B, S, D].
    """
    B, S, D = q.shape
    d_k = D // num_heads
    tq = _tile_sublane(S, tq)
    tkv = _tile_sublane(S, tkv)
    grid = (B, S // tq, S // tkv)

    kernel = functools.partial(
        _attn_kernel, num_heads=num_heads, d_k=d_k, scale=1.0 / math.sqrt(d_k))

    q_spec = pl.BlockSpec((None, tq, D), lambda b, qi, ki: (b, qi, 0))
    kv_spec = pl.BlockSpec((None, tkv, D), lambda b, qi, ki: (b, ki, 0))

    return pl.pallas_call(
        kernel,
        out_shape=jax.ShapeDtypeStruct((B, S, D), q.dtype),
        grid_spec=pltpu.PrefetchScalarGridSpec(
            num_scalar_prefetch=0,
            grid=grid,
            in_specs=[q_spec, kv_spec, kv_spec],
            out_specs=pl.BlockSpec((None, tq, D), lambda b, qi, ki: (b, qi, 0)),
            scratch_shapes=[
                pltpu.VMEM((tq, num_heads), jnp.float32),   # running max m
                pltpu.VMEM((tq, num_heads), jnp.float32),   # running sum l
                pltpu.VMEM((tq, D), jnp.float32),           # lane-dense acc
            ],
        ),
        compiler_params=pltpu.CompilerParams(
            dimension_semantics=("parallel", "parallel", "arbitrary")),
    )(q, k, v)


def multi_head_attention(Q, K, V, params, num_heads):
    """Forward pass matching the PyTorch MultiHeadAttention module (mask=None)."""
    B, S, D = Q.shape

    # Fused Q/K/V projection: stack activations and weights along a leading grid
    # axis -> one tiled, pipelined pallas_call instead of three.
    x_stack = jnp.stack(
        [Q.reshape(B * S, D), K.reshape(B * S, D), V.reshape(B * S, D)], axis=0)
    w_stack = jnp.stack([params["w_q"], params["w_k"], params["w_v"]], axis=0)
    b_stack = jnp.stack([params["b_q"], params["b_k"], params["b_v"]],
                        axis=0).reshape(3, 1, D)

    qkv = pallas_linear_stacked(x_stack, w_stack, b_stack)        # [3, B*S, D]
    q_p = qkv[0].reshape(B, S, D)
    k_p = qkv[1].reshape(B, S, D)
    v_p = qkv[2].reshape(B, S, D)

    # Attention stays in [B, S, D]; heads are handled as column slices inside
    # the kernel -> no split_heads / combine_heads transposes or extra HBM passes.
    attn = pallas_attention(q_p, k_p, v_p, num_heads=num_heads)   # [B, S, D]

    # Output projection W_o.
    out = pallas_linear_stacked(
        attn.reshape(1, B * S, D),
        params["w_o"].reshape(1, D, D),
        params["b_o"].reshape(1, 1, D))[0]
    return out.reshape(B, S, D)


# ------------------------------ Reference ------------------------------------

def multi_head_attention_ref(Q, K, V, params, num_heads):
    B, S, D = Q.shape
    d_k = D // num_heads

    def lin(x, w, b):
        return x @ w.T + b

    def split(x):
        return x.reshape(B, S, num_heads, d_k).transpose(0, 2, 1, 3)

    qh = split(lin(Q, params["w_q"], params["b_q"]))
    kh = split(lin(K, params["w_k"], params["b_k"]))
    vh = split(lin(V, params["w_v"], params["b_v"]))

    scores = jnp.einsum("bhqd,bhkd->bhqk", qh, kh) / math.sqrt(d_k)
    probs = jax.nn.softmax(scores, axis=-1)
    attn = jnp.einsum("bhqk,bhkd->bhqd", probs, vh)
    combined = attn.transpose(0, 2, 1, 3).reshape(B, S, D)
    return lin(combined, params["w_o"], params["b_o"])


# -------------------------------- Main ----------------------------------------

if __name__ == "__main__":
    d_model = 32
    num_heads = 4
    batch = 2
    seq = 8

    key = jax.random.PRNGKey(0)
    keys = jax.random.split(key, 12)

    # Deterministic synthetic parameter init (nn.Linear shapes: W [out, in], b [out]).
    scale = 1.0 / math.sqrt(d_model)
    params = {
        "w_q": jax.random.uniform(keys[0], (d_model, d_model), jnp.float32, -scale, scale),
        "b_q": jax.random.uniform(keys[1], (d_model,), jnp.float32, -scale, scale),
        "w_k": jax.random.uniform(keys[2], (d_model, d_model), jnp.float32, -scale, scale),
        "b_k": jax.random.uniform(keys[3], (d_model,), jnp.float32, -scale, scale),
        "w_v": jax.random.uniform(keys[4], (d_model, d_model), jnp.float32, -scale, scale),
        "b_v": jax.random.uniform(keys[5], (d_model,), jnp.float32, -scale, scale),
        "w_o": jax.random.uniform(keys[6], (d_model, d_model), jnp.float32, -scale, scale),
        "b_o": jax.random.uniform(keys[7], (d_model,), jnp.float32, -scale, scale),
    }

    Q = jax.random.normal(keys[8], (batch, seq, d_model), jnp.float32)
    K = jax.random.normal(keys[9], (batch, seq, d_model), jnp.float32)
    V = jax.random.normal(keys[10], (batch, seq, d_model), jnp.float32)

    out = multi_head_attention(Q, K, V, params, num_heads)
    out = jax.block_until_ready(out)

    ref = multi_head_attention_ref(Q, K, V, params, num_heads)
    assert out.shape == (batch, seq, d_model)
    # Tolerance accounts for approximate EUP reciprocal in softmax normalization.
    assert jnp.allclose(out, ref, atol=5e-3, rtol=5e-3), "mismatch vs. reference"

    print("KERNEL_OK")
</pallas_src>

<mosaic_0001>
module attributes {stable_mosaic.version = 11 : i64} {
  func.func @_linear_kernel_single_k(%arg0: i32, %arg1: i32, %arg2: i32, %arg3: memref<1x16x32xf32, #tpu.memory_space<vmem>>, %arg4: memref<1x32x32xf32, #tpu.memory_space<vmem>>, %arg5: memref<1x1x32xf32, #tpu.memory_space<vmem>>, %arg6: memref<1x16x32xf32, #tpu.memory_space<vmem>>) attributes {dimension_semantics = [#tpu.dimension_semantics<parallel>, #tpu.dimension_semantics<parallel>, #tpu.dimension_semantics<parallel>], iteration_bounds = array<i64: 3, 1, 1>, scalar_prefetch = 0 : i64, scratch_operands = 0 : i64, tpu.core_type = #tpu.core_type<tc>, window_params = [{transform_indices = @transform_0, window_bounds = array<i64: 1, 16, 32>}, {transform_indices = @transform_1, window_bounds = array<i64: 1, 32, 32>}, {transform_indices = @transform_2, window_bounds = array<i64: 1, 1, 32>}, {transform_indices = @transform_3, window_bounds = array<i64: 1, 16, 32>}]} {
    %c0 = arith.constant 0 : index
    %c0_0 = arith.constant 0 : index
    %c0_1 = arith.constant 0 : index
    %0 = vector.load %arg3[%c0, %c0_0, %c0_1] : memref<1x16x32xf32, #tpu.memory_space<vmem>>, vector<1x16x32xf32>
    %1 = vector.shape_cast %0 : vector<1x16x32xf32> to vector<16x32xf32>
    %c0_2 = arith.constant 0 : index
    %c0_3 = arith.constant 0 : index
    %c0_4 = arith.constant 0 : index
    %2 = vector.load %arg4[%c0_2, %c0_3, %c0_4] : memref<1x32x32xf32, #tpu.memory_space<vmem>>, vector<1x32x32xf32>
    %3 = vector.shape_cast %2 : vector<1x32x32xf32> to vector<32x32xf32>
    %cst = arith.constant dense<0.000000e+00> : vector<16x32xf32>
    %4 = tpu.matmul %1, %3, %cst {dimension_numbers = #tpu.dot_dimension_numbers<[1], [1], [0], [0], [0, 0, 1, 0], [], []>} : vector<16x32xf32>, vector<32x32xf32>, vector<16x32xf32> -> vector<16x32xf32>
    %c0_5 = arith.constant 0 : index
    %c0_6 = arith.constant 0 : index
    %c0_7 = arith.constant 0 : index
    %5 = vector.load %arg5[%c0_5, %c0_6, %c0_7] : memref<1x1x32xf32, #tpu.memory_space<vmem>>, vector<1x1x32xf32>
    %6 = vector.shape_cast %5 : vector<1x1x32xf32> to vector<1x32xf32>
    %7 = vector.broadcast %6 : vector<1x32xf32> to vector<16x32xf32>
    %8 = arith.addf %4, %7 : vector<16x32xf32>
    %c0_8 = arith.constant 0 : index
    %c0_9 = arith.constant 0 : index
    %c0_10 = arith.constant 0 : index
    %9 = vector.load %arg6[%c0_8, %c0_9, %c0_10] : memref<1x16x32xf32, #tpu.memory_space<vmem>>, vector<1x16x32xf32>
    %10 = vector.shape_cast %9 : vector<1x16x32xf32> to vector<16x32xf32>
    %11 = vector.shape_cast %8 : vector<16x32xf32> to vector<1x16x32xf32>
    tpu.vector_store %arg6[%c0_8, %c0_9, %c0_10], %11 {strides = array<i32>} : memref<1x16x32xf32, #tpu.memory_space<vmem>>, vector<1x16x32xf32>,
    return
  }
  func.func @transform_0(%arg0: i32, %arg1: i32, %arg2: i32) -> (i32, i32, i32) {
    %c0_i32 = arith.constant 0 : i32
    %c0_i32_0 = arith.constant 0 : i32
    return %arg0, %arg1, %c0_i32 : i32, i32, i32
  }
  func.func @transform_1(%arg0: i32, %arg1: i32, %arg2: i32) -> (i32, i32, i32) {
    %c0_i32 = arith.constant 0 : i32
    %c0_i32_0 = arith.constant 0 : i32
    return %arg0, %arg2, %c0_i32 : i32, i32, i32
  }
  func.func @transform_2(%arg0: i32, %arg1: i32, %arg2: i32) -> (i32, i32, i32) {
    %c0_i32 = arith.constant 0 : i32
    %c0_i32_0 = arith.constant 0 : i32
    return %arg0, %c0_i32, %arg2 : i32, i32, i32
  }
  func.func @transform_3(%arg0: i32, %arg1: i32, %arg2: i32) -> (i32, i32, i32) {
    %c0_i32 = arith.constant 0 : i32
    return %arg0, %arg1, %arg2 : i32, i32, i32
  }
}

</mosaic_0001>

<bundles_post_ra>
// kernel: tpu_custom_call.1
= control target key start
LH: loop header
LB: loop body
LE: loop exit
PB: predicated region body
PF: predicated region fallthrough
CT: control target
= control target key end

     0   :  { %s990_s0 = inlined_call_operand.hbm [shape: f32[3,16,32], index: 0, kind: input, shape index: {}]   ;;  %s991_s1 = inlined_call_operand.hbm [shape: f32[3,32,32], index: 1, kind: input, shape index: {}]   ;;  %s992_s2 = inlined_call_operand.hbm [shape: f32[3,1,32], index: 2, kind: input, shape index: {}]   ;;  %s993_s3 = inlined_call_operand.hbm [shape: f32[3,16,32], index: 3, kind: output, shape index: {}]  }
   0x1   :  { %998 = sst [smem:[#allocation17_spill]] %s991_s1 }
   0x2   :  { %8 = vsyncpa [#allocation3], 0 }
   0x3   :  { %10 = vsyncpa [#allocation3 + $0x1], 0 }
   0x4   :  { %11 = vsyncpa [#allocation6], 0 }
   0x5   :  { %13 = vsyncpa [#allocation6 + $0x1], 0 }
   0x6   :  { %14 = vsyncpa [#allocation4], 0 }
   0x7   :  { %16 = vsyncpa [#allocation4 + $0x1], 0  ;;  %s820_s12 = smov 0   ;;  %s822_s13 = smov 0  }
   0x8   :  { %s824_s14 = smov 0   ;;  %s826_s15 = smov 0  }
   0x9   :  { %s828_s16 = smov 0   ;;  %s830_s17 = smov 0  }
   0xa LB: > { %999 = sst [smem:[#allocation12_spill]] %s774_s12  ;;  %s851_s18 = sadd.s32 4294967295, %s794_s17   ;;  %s794_s17 = sphi %s830_s17, %s22_s17   ;;  %s790_s16 = sphi %s828_s16, %s1018_s16   ;;  %s786_s15 = sphi %s826_s15, %s1017_s15   ;;  %s782_s14 = sphi %s824_s14, %s1013_s14   ;;  %s778_s13 = sphi %s822_s13, %s1016_s13   ;;  %s774_s12 = sphi %s820_s12, %s1015_s12  }
   0xb   : > { %1000 = sst [smem:[#allocation13_spill]] %s782_s14  ;;  %s510_s19 = sadd.s32 4294967294, %s794_s17  }
   0xc   : > { %s41_s20 = sadd.s32 1, %s790_s16  ;;  %s50_s21 = sadd.s32 1, %s782_s14 }
   0xd   : > { %p43_p0 = scmp.ge.s32.totalorder %s41_s20, 3  ;;  %p57_p1 = scmp.ne.s32.totalorder %s782_s14, %s778_s13 }
   0xe   : > { %p58_p2 = scmp.eq.s32.totalorder %s794_s17, 0  ;;  %p63_p3 = scmp.ne.s32.totalorder %s778_s13, %s774_s12 }
   0xf   : > { %s1020_s20 = smov (%p43_p0, %s41_s20), 0  ;;  %p64_p5 = scmp.eq.s32.totalorder %s851_s18, 0 }
  0x10   : > { %1001 = sst [smem:[#allocation14_spill]] %s1020_s20  ;;  %p59_p4 = por %p58_p2, %p57_p1 }
  0x11   : > { %s45_s22 = ssub.s32 %s790_s16, %s1020_s20  ;;  %p147_p6 = scmp.eq.s32.totalorder %s851_s18, 2 }
  0x12   : > { %p48_p7 = scmp.eq.s32.totalorder %s45_s22, 0  ;;  %p867_p8 = por %p64_p5, %p63_p3 }
  0x13   : > { %p871_p9 = por %p147_p6, %p57_p1  ;;  %p153_p10 = scmp.eq.s32.totalorder %s510_s19, 2 }
  0x14   : > { %s876_s25 = scalar_select %p48_p7, %s782_s14, %s50_s21  }
  0x15   : > { %p878_p11 = por %p153_p10, %p63_p3  ;;  %p563_p12 = scmp.lt.s32.totalorder %s794_s17, 3 }
  0x16   : > { %1004 = sst [smem:[#allocation15_spill]] %s876_s25  ;;  %s884_s27 = sand.u32 1, %s782_s14  }
  0x17   : > { %s1005_s26 = scalar_select %p878_p11, 1, 0 }
  0x18   : > { %p886_p13 = pnand %p563_p12, %p59_p4  ;;  %s197_s29 = sand.u32 1, %s794_s17  }
  0x19   : > { %1006 = sst [smem:[#allocation16_spill]] %s1005_s26  ;;  %s516_s30 = sshll.u32 %s884_s27, 5 }
  0x1a   : > { %s535_s4 = sshll.u32 %s790_s16, 5  ;;  %s201_s5 = scalar_lea.vmem [#allocation5], %s516_s30 }
  0x1b   : > { %s211_s6 = sshll.u32 %s201_s5, 4  ;;  %s1008_s1 = sld [smem:[#allocation17_spill]]  ;;  %s212_s6 = int_to_ptr.vmem [resolvable:$true] %s211_s6 }
  0x1c   : > { %p519_p0 = scmp.ge.s32.totalorder %s794_s17, 1  ;;  %p237_p1 = scmp.lt.s32.totalorder %s794_s17, 4 }
  0x1d   : > { %s198_s11 = scalar_lea.sflag [#allocation6], %s197_s29  ;;  %s796_s19 = smov 128  }
  0x1e   : > { %s797_s21 = smov 8   ;;  %p900_p2 = pnand %p519_p0, %p237_p1 }
  0x1f   : > { %s513_s30 = sshll.u32 %s884_s27, 4  ;;  %s174_s29 = scalar_lea.sflag [#allocation3], %s884_s27 }
  0x20   : > { %s228_s25 = scalar_lea.hbm %s992_s2, %s790_s16  ;;  %s224_s26 = scalar_lea.vmem [#allocation7], %s884_s27 }
  0x21   : > { %s208_s9 = scalar_lea.hbm %s1008_s1, %s535_s4  ;;  %s534_s4 = sshll.u32 %s790_s16, 4 }
  0x22   : > { %s209_s10 = sshll.u32 %s208_s9, 4  ;;  %s184_s8 = scalar_lea.hbm %s990_s0, %s534_s4  ;;  %s210_s10 = int_to_ptr.hbm [resolvable:$true] %s209_s10 }
  0x23   : > { %555 = dma.hbm_to_vmem [thread:$0]  (!%p886_p13), %s210_s10, 512, %s212_s6, %s198_s11, %s796_s19, %s796_s19, %s797_s21  }
  0x24   : > { %s185_s9 = sshll.u32 %s184_s8, 4  ;;  %s177_s1 = scalar_lea.vmem [#allocation2], %s513_s30  ;;  %s186_s9 = int_to_ptr.hbm [resolvable:$true] %s185_s9 }
  0x25   : > { %s187_s20 = sshll.u32 %s177_s1, 4  ;;  %s230_s14 = sshll.u32 %s228_s25, 4  ;;  %s188_s20 = int_to_ptr.vmem [resolvable:$true] %s187_s20  ;;  %s231_s14 = int_to_ptr.hbm [resolvable:$true] %s230_s14 }
  0x26   : > { %552 = dma.hbm_to_vmem [thread:$0]  (!%p886_p13), %s186_s9, 256, %s188_s20, %s174_s29, %s796_s19, %s796_s19, %s797_s21  }
  0x27   : > { %s232_s12 = sshll.u32 %s224_s26, 4  ;;  %241 = sbr.rel (%p900_p2) target bundleno = 197 (0xc5), region = 32  ;;  %s233_s12 = int_to_ptr.vmem [resolvable:$true] %s232_s12 }
  0x28   : > { %558 = dma.hbm_to_vmem [thread:$0]  (!%p886_p13), %s231_s14, 16, %s233_s12, %s198_s11  }
  0x29   : > { %s922_s1 = sand.u32 (!%p900_p2), 1, %s778_s13  }
  0x2a   : > { %s520_s20 = sshll.u32 (!%p900_p2), %s922_s1, 4  ;;  %s244_s19 = scalar_lea.sflag (!%p900_p2), [#allocation3], %s922_s1 }
  0x2b   : > { %s247_s25 = scalar_lea.vmem (!%p900_p2), [#allocation2], %s520_s20 }
  0x2c   : > { %761 = dma.done.wait (%p867_p8), %s244_s19, 256  }
  0x2d   : > { %763 = vsyncadd (%p867_p8), %s244_s19, 4294967040  ;;  %s253_s12 = sand.u32 1, %s851_s18   ;;  %s521_s14 = sshll.u32 %s922_s1, 5 }
  0x2e   : > { %s254_s26 = scalar_lea.sflag [#allocation6], %s253_s12  ;;  %s257_s27 = scalar_lea.vmem [#allocation5], %s521_s14 }
  0x2f   : > { %765 = dma.done.wait (%p867_p8), %s254_s26, 528  }
  0x30   : > { %767 = vsyncadd (%p867_p8), %s254_s26, 4294966768  ;;  %vm312_vm0 = vcmask 261120   ;;  %v307_v0 = vld [vmem:[%s257_s27 + $0x18] sm:$0xff]  ;;  %v306_v1 = vld [vmem:[%s257_s27 + $0x10] sm:$0xff]  ;;  %s266_s28 = scalar_lea.vmem [#allocation7], %s922_s1  ;;  %s536_s18 = sshll.u32 %s786_s15, 4 }
  0x31   : > { %523 = vmatpush.xpose.msk.msra.mxu0 %vm312_vm0, %v307_v0  ;;  %537 = vmatpush.xpose.msk.msra.mxu1 %vm312_vm0, %v307_v0  ;;  %v305_v2 = vld [vmem:[%s257_s27 + $0x8] sm:$0xff]  ;;  %v304_v3 = vld [vmem:[%s257_s27] sm:$0xff]  ;;  %s371_s21 = scalar_lea.hbm %s993_s3, %s536_s18  ;;  %s298_s22 = scalar_lea.vmem [#allocation8], %s520_s20 }
  0x32   : > { %v302_v4 = vld [vmem:[%s247_s25] sm:$0xff]  ;;  %v303_v5 = vld [vmem:[%s247_s25 + $0x8] sm:$0xff]  ;;  %s372_s30 = sshll.u32 %s298_s22, 4  ;;  %s374_s4 = sshll.u32 %s371_s21, 4  ;;  %s373_s30 = int_to_ptr.vmem [resolvable:$true] %s372_s30  ;;  %s375_s4 = int_to_ptr.hbm [resolvable:$true] %s374_s4 }
  0x33   : > { %v617_v6 = vld [vmem:[%s266_s28] ss:$0 sm:$0xff]  ;;  %s357_s15 = scalar_lea.sflag [#allocation4], %s922_s1  ;;  %s722_s5 = sshra.s32 %s375_s4, 4  ;;  %s723_s5 = int_to_ptr.hbm [resolvable:$true] %s722_s5 }
  0x34   : > { %s724_s7 = scalar_lea.hbm %s723_s5, 16  ;;  %s728_s29 = scalar_lea.hbm %s993_s3, 48 }
  0x35   : > { %524 = vmatpush.xpose.msk.msra.mxu0 %vm312_vm0, %v306_v1  ;;  %538 = vmatpush.xpose.msk.msra.mxu1 %vm312_vm0, %v306_v1  ;;  %p725_p3 = scmp.ne.s32.totalorder %s723_s5, %s724_s7  ;;  %p729_p6 = scmp.lt.s32.totalorder %s723_s5, %s993_s3 }
  0x36   : > { %p730_p7 = scmp.lt.s32.totalorder %s728_s29, %s724_s7 }
  0x37   : > { %p726_p4 = pnand %p725_p3, %p871_p9 }
  0x38   : > { %p731_p8 = por %p730_p7, %p729_p6 }
  0x39   : > { %525 = vmatpush.xpose.msk.msra.mxu0 %vm312_vm0, %v305_v2  ;;  %539 = vmatpush.xpose.msk.msra.mxu1 %vm312_vm0, %v305_v2  ;;  %p727_p5 = pneg %p726_p4 }
  0x3b   : > { %p732_p10 = pnand %p731_p8, %p727_p5 }
  0x3d   : > { %526 = vmatpush.xpose.msk.msra.mxu0 %vm312_vm0, %v304_v3  ;;  %540 = vmatpush.xpose.msk.msra.mxu1 %vm312_vm0, %v304_v3 }
  0x40   : > { %527 = vmatmul.msk.f32.vlgmr.msra.gmra.mxu0 %vm312_vm0, %v302_v4  ;;  %528 = vmatmul.msk.f32.vlgmr.msra.gmra.mxu1 %vm312_vm0, %v303_v5 }
  0xbd   : > { %v348_v7 = vpop.f32.mrf.mxu0  ;;  %v351_v8 = vpop.f32.mrf.mxu1 }
  0xbe   : > { %v349_v9 = vadd.f32 %v617_v6, %v348_v7  ;;  %v352_v10 = vadd.f32 %v617_v6, %v351_v8 }
  0xc0   : > { %354 = vst.msk [vmem:[%s298_s22] sm:$0xff] %vm312_vm0, %v349_v9 }
  0xc1   : > { %355 = vst.msk [vmem:[%s298_s22 + $0x8] sm:$0xff] %vm312_vm0, %v352_v10 }
  0xc2   : > { %735 = shalt.err (!%p732_p10)
}
  0xc3   : > { %s798_s1 = smov 128   ;;  %s799_s20 = smov 8  }
  0xc4   : > { %547 = dma.vmem_to_hbm [thread:$0]  (%p871_p9), %s373_s30, 256, %s375_s4, %s357_s15, %s798_s1, %s798_s1, %s799_s20  }
  0xc5 PF: > { %s1010_s19 = sld [smem:[#allocation12_spill]]  ;;  %p564_p12 = scmp.ge.s32.totalorder %s794_s17, 2 }
  0xc7   : > { %p560_p13 = pnand %p564_p12, %p878_p11 }
  0xc9   : > { %p561_p0 = pneg %p560_p13 }
  0xcb   : > { %s389_s12 = sand.u32 1, %s1010_s19  }
  0xcc   : > { %s390_s14 = scalar_lea.sflag [#allocation4], %s389_s12 }
  0xcd   : > { %769 = dma.done.wait (%p561_p0), %s390_s14, 256  }
  0xce   : > { %771 = vsyncadd (%p561_p0), %s390_s14, 4294967040  ;;  %s22_s17 = sadd.s32 1, %s794_s17   ;;  %s1012_s26 = sld [smem:[#allocation13_spill]] }
  0xcf   : > { %p19_p1 = scmp.ge.s32.totalorder %s22_s17, 5   ;;  %s1013_s14 = sld [smem:[#allocation15_spill]] }
  0xd0   : > { %s1014_s24 = sld [smem:[#allocation14_spill]]  ;;  %s1015_s12 = smov %s778_s13 }
  0xd1   : > { %s1017_s15 = smov %s790_s16 }
  0xd2   :  { %21 = sbr.rel (!%p19_p1) target bundleno = 10 (0xa), region = 101 }
  0xd4   : > { %s1016_s13 = smov %s1012_s26 }
  0xd6   : > { %s1018_s16 = smov %s1014_s24 }
  0xd7   :  { %396 = vsyncpa [#allocation3], 1 }
  0xd8   :  { %398 = vsyncpa [#allocation3 + $0x1], 1 }
  0xd9   :  { %399 = vsyncpa [#allocation6], 1 }
  0xda   :  { %401 = vsyncpa [#allocation6 + $0x1], 1 }
  0xdb   :  { %402 = vsyncpa [#allocation4], 1 }
  0xdc   :  { %404 = vsyncpa [#allocation4 + $0x1], 1 }

</bundles_post_ra>
